<compile_context>
chip_gen: v7x
topology: tpu7x:2x2x1
jax: 0.10.0
libtpu: 0.0.40
codegen_flags: <defaults>
</compile_context>

<pallas_src>
import jax
import jax.numpy as jnp
from jax.experimental import pallas as pl
from jax.experimental.pallas import tpu as pltpu

D_IN = 256
D_HID = 256
D_OUT = 2


def _round_up(x, m):
    return (x + m - 1) // m * m


def _mlp_kernel(x_ref, w1_ref, b1_ref, w2_ref, b2_ref, o_ref):
    # x_ref:  [TB, 256] (input dtype)   w1_ref: [256, 256] bf16
    # b1_ref: [1, 256]  f32             w2_ref: [256, 2]   bf16 (unpadded)
    # b2_ref: [1, 2]    f32             o_ref:  [TB, 2]    f32
    x = x_ref[...].astype(jnp.bfloat16)                    # cast on the VMEM tile
    h = jnp.dot(x, w1_ref[...], preferred_element_type=jnp.float32)
    h = jnp.maximum(h + b1_ref[...], 0.0)                  # bias + ReLU in f32 (VPU)
    y = jnp.dot(h.astype(jnp.bfloat16), w2_ref[...],
                preferred_element_type=jnp.float32)
    o_ref[...] = (y + b2_ref[...]).astype(o_ref.dtype)     # narrow (TB, 2) store


def _pick_tile(B, tile_b):
    """Batch tile: multiple of 8 (f32 sublanes), capped at tile_b.

    For batches that fit in one tile but are big enough to matter (>=1024 rows)
    we split into two tiles so the 'parallel' grid axis can be sharded across
    both v7x TensorCores.  Tiny batches stay single-tile (latency-dominated;
    extra grid steps would only add the ~0.35 us per-step overhead).
    """
    B8 = _round_up(B, 8)
    if B8 > tile_b:
        return tile_b
    if B8 >= 1024:
        return _round_up(pl.cdiv(B8, 2), 8)
    return B8


def domain_classifier_forward(x, w1, b1, w2, b2, *, tile_b=2048):
    """x: any shape [B, ...] whose trailing dims flatten to 256 features."""
    B = x.shape[0]
    x_flat = x.reshape(B, -1)                 # keep original dtype; bf16 cast in-kernel
    assert x_flat.shape[1] == D_IN, (
        f"expected {D_IN} flattened features, got {x_flat.shape[1]}")

    TB = _pick_tile(B, tile_b)
    grid = (pl.cdiv(B, TB),)                  # no padding of x: last block is masked

    # Weights -> bf16 for the MXU; layer 2 stays at its natural (256, 2) shape.
    w1b = w1.astype(jnp.bfloat16)
    b1f = b1.reshape(1, D_HID).astype(jnp.float32)
    w2b = w2.reshape(D_HID, D_OUT).astype(jnp.bfloat16)
    b2f = b2.reshape(1, D_OUT).astype(jnp.float32)

    flops = 2 * B * D_IN * D_HID + 2 * B * D_HID * D_OUT
    bytes_accessed = (
        x_flat.size * x_flat.dtype.itemsize          # activation stream (dominant)
        + w1b.size * 2 + w2b.size * 2                # bf16 weights
        + b1f.size * 4 + b2f.size * 4                # f32 biases
        + B * D_OUT * 4)                             # narrow f32 output

    out = pl.pallas_call(
        _mlp_kernel,
        out_shape=jax.ShapeDtypeStruct((B, D_OUT), jnp.float32),
        grid_spec=pltpu.PrefetchScalarGridSpec(
            num_scalar_prefetch=0,
            grid=grid,
            in_specs=[
                pl.BlockSpec((TB, D_IN), lambda i: (i, 0)),        # batch-tiled x
                pl.BlockSpec((D_IN, D_HID), lambda i: (0, 0)),     # resident w1
                pl.BlockSpec((1, D_HID), lambda i: (0, 0)),        # resident b1
                pl.BlockSpec((D_HID, D_OUT), lambda i: (0, 0)),    # resident w2
                pl.BlockSpec((1, D_OUT), lambda i: (0, 0)),        # resident b2
            ],
            out_specs=pl.BlockSpec((TB, D_OUT), lambda i: (i, 0)),
        ),
        compiler_params=pltpu.CompilerParams(
            dimension_semantics=("parallel",),       # dual-TC sharding on v7x
            vmem_limit_bytes=32 << 20),              # above v5e's 16 MiB default
        cost_estimate=pl.CostEstimate(
            flops=flops, transcendentals=0, bytes_accessed=bytes_accessed),
    )(x_flat, w1b, b1f, w2b, b2f)

    return out


def init_params(key):
    """Deterministic init mirroring nn.Linear default: U(-1/sqrt(fan_in), 1/sqrt(fan_in))."""
    k1, k2, k3, k4 = jax.random.split(key, 4)
    bound1 = 1.0 / jnp.sqrt(jnp.float32(D_IN))
    bound2 = 1.0 / jnp.sqrt(jnp.float32(D_HID))
    # Stored as [in, out] (transpose of PyTorch's [out, in]); semantics identical.
    w1 = jax.random.uniform(k1, (D_IN, D_HID), jnp.float32, -bound1, bound1)
    b1 = jax.random.uniform(k2, (1, D_HID), jnp.float32, -bound1, bound1)
    w2 = jax.random.uniform(k3, (D_HID, D_OUT), jnp.float32, -bound2, bound2)
    b2 = jax.random.uniform(k4, (1, D_OUT), jnp.float32, -bound2, bound2)
    return w1, b1, w2, b2


def _reference(x, w1, b1, w2, b2):
    x_flat = x.reshape(x.shape[0], -1).astype(jnp.float32)
    return jnp.maximum(x_flat @ w1 + b1, 0.0) @ w2 + b2


if __name__ == "__main__":
    key = jax.random.PRNGKey(0)
    kx, kp, kx2, kx3 = jax.random.split(key, 4)

    w1, b1, w2, b2 = init_params(kp)

    # Small NCHW-style feature map whose flatten is 256 features: (B=8, C=4, H=8, W=8).
    x = jax.random.normal(kx, (8, 4, 8, 8), dtype=jnp.float32)
    out = jax.block_until_ready(domain_classifier_forward(x, w1, b1, w2, b2))
    ref = _reference(x, w1, b1, w2, b2)
    assert out.shape == (8, D_OUT)
    # bf16 matmul inputs with f32 accumulation -> relaxed tolerance vs f32 reference.
    assert jnp.allclose(out, ref, atol=5e-2, rtol=5e-2)

    # Ragged batch (B not a multiple of 8) exercises the masked last block.
    x2 = jax.random.normal(kx2, (5, D_IN), dtype=jnp.float32)
    out2 = jax.block_until_ready(domain_classifier_forward(x2, w1, b1, w2, b2))
    ref2 = _reference(x2, w1, b1, w2, b2)
    assert out2.shape == (5, D_OUT)
    assert jnp.allclose(out2, ref2, atol=5e-2, rtol=5e-2)

    # Multi-tile non-divisible grid (B=20 with a forced TB=8 -> grid of 3,
    # partial last block) exercises the no-pad boundary-masking path.
    x3 = jax.random.normal(kx3, (20, D_IN), dtype=jnp.float32)
    out3 = jax.block_until_ready(
        domain_classifier_forward(x3, w1, b1, w2, b2, tile_b=8))
    ref3 = _reference(x3, w1, b1, w2, b2)
    assert out3.shape == (20, D_OUT)
    assert jnp.allclose(out3, ref3, atol=5e-2, rtol=5e-2)

    print("KERNEL_OK")
</pallas_src>

<mosaic_0001>
module attributes {stable_mosaic.version = 11 : i64} {
  func.func @_mlp_kernel(%arg0: i32, %arg1: memref<8x256xf32, #tpu.memory_space<vmem>>, %arg2: memref<256x256xbf16, #tpu.memory_space<vmem>>, %arg3: memref<1x256xf32, #tpu.memory_space<vmem>>, %arg4: memref<256x2xbf16, #tpu.memory_space<vmem>>, %arg5: memref<1x2xf32, #tpu.memory_space<vmem>>, %arg6: memref<8x2xf32, #tpu.memory_space<vmem>>) attributes {dimension_semantics = [#tpu.dimension_semantics<parallel>], iteration_bounds = array<i64: 1>, scalar_prefetch = 0 : i64, scratch_operands = 0 : i64, tpu.core_type = #tpu.core_type<tc>, window_params = [{transform_indices = @transform_0, window_bounds = array<i64: 8, 256>}, {pipeline_mode = #tpu.pipeline_mode<synchronous>, transform_indices = @transform_1, window_bounds = array<i64: 256, 256>}, {pipeline_mode = #tpu.pipeline_mode<synchronous>, transform_indices = @transform_2, window_bounds = array<i64: 1, 256>}, {pipeline_mode = #tpu.pipeline_mode<synchronous>, transform_indices = @transform_3, window_bounds = array<i64: 256, 2>}, {pipeline_mode = #tpu.pipeline_mode<synchronous>, transform_indices = @transform_4, window_bounds = array<i64: 1, 2>}, {transform_indices = @transform_5, window_bounds = array<i64: 8, 2>}]} {
    %c0 = arith.constant 0 : index
    %c0_0 = arith.constant 0 : index
    %0 = vector.load %arg1[%c0, %c0_0] : memref<8x256xf32, #tpu.memory_space<vmem>>, vector<8x256xf32>
    %1 = arith.truncf %0 : vector<8x256xf32> to vector<8x256xbf16>
    %c0_1 = arith.constant 0 : index
    %c0_2 = arith.constant 0 : index
    %2 = vector.load %arg2[%c0_1, %c0_2] : memref<256x256xbf16, #tpu.memory_space<vmem>>, vector<256x256xbf16>
    %cst = arith.constant dense<0.000000e+00> : vector<8x256xf32>
    %3 = tpu.matmul %1, %2, %cst {dimension_numbers = #tpu.dot_dimension_numbers<[1], [0], [0], [1], [0, 0, 1, 1], [], []>} : vector<8x256xbf16>, vector<256x256xbf16>, vector<8x256xf32> -> vector<8x256xf32>
    %c0_3 = arith.constant 0 : index
    %c0_4 = arith.constant 0 : index
    %4 = vector.load %arg3[%c0_3, %c0_4] : memref<1x256xf32, #tpu.memory_space<vmem>>, vector<1x256xf32>
    %5 = vector.broadcast %4 : vector<1x256xf32> to vector<8x256xf32>
    %6 = arith.addf %3, %5 : vector<8x256xf32>
    %cst_5 = arith.constant 0.000000e+00 : f32
    %7 = vector.broadcast %cst_5 : f32 to vector<8x256xf32>
    %8 = arith.maximumf %6, %7 : vector<8x256xf32>
    %9 = arith.truncf %8 : vector<8x256xf32> to vector<8x256xbf16>
    %c0_6 = arith.constant 0 : index
    %c0_7 = arith.constant 0 : index
    %10 = vector.load %arg4[%c0_6, %c0_7] : memref<256x2xbf16, #tpu.memory_space<vmem>>, vector<256x2xbf16>
    %cst_8 = arith.constant dense<0.000000e+00> : vector<8x2xf32>
    %11 = tpu.matmul %9, %10, %cst_8 {dimension_numbers = #tpu.dot_dimension_numbers<[1], [0], [0], [1], [0, 0, 1, 1], [], []>} : vector<8x256xbf16>, vector<256x2xbf16>, vector<8x2xf32> -> vector<8x2xf32>
    %c0_9 = arith.constant 0 : index
    %c0_10 = arith.constant 0 : index
    %12 = vector.load %arg5[%c0_9, %c0_10] : memref<1x2xf32, #tpu.memory_space<vmem>>, vector<1x2xf32>
    %13 = vector.broadcast %12 : vector<1x2xf32> to vector<8x2xf32>
    %14 = arith.addf %11, %13 : vector<8x2xf32>
    %c0_11 = arith.constant 0 : index
    %c0_12 = arith.constant 0 : index
    %15 = vector.load %arg6[%c0_11, %c0_12] : memref<8x2xf32, #tpu.memory_space<vmem>>, vector<8x2xf32>
    tpu.vector_store %arg6[%c0_11, %c0_12], %14 {strides = array<i32>} : memref<8x2xf32, #tpu.memory_space<vmem>>, vector<8x2xf32>,
    return
  }
  func.func @transform_0(%arg0: i32) -> (i32, i32) {
    %c0_i32 = arith.constant 0 : i32
    %c0_i32_0 = arith.constant 0 : i32
    return %arg0, %c0_i32 : i32, i32
  }
  func.func @transform_1(%arg0: i32) -> (i32, i32) {
    %c0_i32 = arith.constant 0 : i32
    %c0_i32_0 = arith.constant 0 : i32
    %c0_i32_1 = arith.constant 0 : i32
    return %c0_i32, %c0_i32_0 : i32, i32
  }
  func.func @transform_2(%arg0: i32) -> (i32, i32) {
    %c0_i32 = arith.constant 0 : i32
    %c0_i32_0 = arith.constant 0 : i32
    %c0_i32_1 = arith.constant 0 : i32
    return %c0_i32, %c0_i32_0 : i32, i32
  }
  func.func @transform_3(%arg0: i32) -> (i32, i32) {
    %c0_i32 = arith.constant 0 : i32
    %c0_i32_0 = arith.constant 0 : i32
    %c0_i32_1 = arith.constant 0 : i32
    return %c0_i32, %c0_i32_0 : i32, i32
  }
  func.func @transform_4(%arg0: i32) -> (i32, i32) {
    %c0_i32 = arith.constant 0 : i32
    %c0_i32_0 = arith.constant 0 : i32
    %c0_i32_1 = arith.constant 0 : i32
    return %c0_i32, %c0_i32_0 : i32, i32
  }
  func.func @transform_5(%arg0: i32) -> (i32, i32) {
    %c0_i32 = arith.constant 0 : i32
    %c0_i32_0 = arith.constant 0 : i32
    return %arg0, %c0_i32 : i32, i32
  }
}

</mosaic_0001>

<bundles_post_ra>
// kernel: tpu_custom_call.1
= control target key start
LH: loop header
LB: loop body
LE: loop exit
PB: predicated region body
PF: predicated region fallthrough
CT: control target
= control target key end

     0   :  { %10 = vsyncpa [#allocation3], 0  ;;  %s632_s18 = smov [#allocation2]   ;;  %s740_s0 = inlined_call_operand.vmem [shape: f32[8,256], index: 0, kind: input, shape index: {}]   ;;  %s741_s1 = inlined_call_operand.hbm [shape: bf16[256,256], index: 1, kind: input, shape index: {}]   ;;  %s742_s2 = inlined_call_operand.vmem [shape: f32[1,256], index: 2, kind: input, shape index: {}]   ;;  %s743_s3 = inlined_call_operand.vmem [shape: bf16[256,2], index: 3, kind: input, shape index: {}]   ;;  %s744_s4 = inlined_call_operand.vmem [shape: f32[1,2], index: 4, kind: input, shape index: {}]   ;;  %s745_s5 = inlined_call_operand.vmem [shape: f32[8,2], index: 5, kind: output, shape index: {}]  }
   0x1   :  { %s18_s19 = sshll.u32 %s632_s18, 4  ;;  %s608_s22 = scalar_lea.hbm %s741_s1, 4096  ;;  %s19_s19 = int_to_ptr.vmem [resolvable:$true] %s18_s19 }
   0x2   :  { %p609_p0 = scmp.ne.s32.totalorder %s741_s1, %s608_s22  ;;  %p612_p1 = scmp.lt.u32.totalorder %s608_s22, %s741_s1 }
   0x4   :  { %p614_p2 = pnand %p612_p1, %p609_p0 }
   0x6   :  { %617 = shalt.err (!%p614_p2)
}
   0x7   :  { %s618_s27 = scalar_lea.vmem %s19_s19, 4096  ;;  %p623_p4 = scmp.lt.s32.totalorder %s19_s19, %s19_s19 }
   0x8   :  { %p619_p3 = scmp.ne.s32.totalorder %s19_s19, %s618_s27  ;;  %p624_p5 = scmp.lt.s32.totalorder %s618_s27, %s618_s27 }
   0xa   :  { %p625_p6 = por %p624_p5, %p623_p4 }
   0xc   :  { %p626_p7 = pnand %p625_p6, %p619_p3 }
   0xe   :  { %629 = shalt.err (!%p626_p7)
}
   0xf   :  { %s633_s28 = smov 128   ;;  %s634_s29 = smov 8  }
  0x10   :  { %24 = dma.hbm_to_vmem [thread:$0]  %s741_s1, 4096, %s19_s19, [#allocation3], %s633_s28, %s633_s28, %s634_s29  }
  0x11   :  { %630 = dma.done.wait [#allocation3], 4096  }
  0x12   :  { %631 = vsyncadd [#allocation3], 4294963200  ;;  %v544_v0 = vld [vmem:[#allocation2 + $0x4] ss:$8 sps:$4 sm:$0xff]   ;;  %v546_v1 = vld [vmem:[#allocation2] ss:$8 sps:$4 sm:$0xff]   ;;  %v73_v52 = vlaneseq }
  0x13   :  { %243 = vmatprep.subr.bf16.mxu0 %v544_v0  ;;  %v547_v2 = vld [vmem:[#allocation2 + $0x14] ss:$8 sps:$4 sm:$0xff]   ;;  %v549_v3 = vld [vmem:[#allocation2 + $0x10] ss:$8 sps:$4 sm:$0xff]   ;;  %v550_v4 = vld [vmem:[#allocation2 + $0x24] ss:$8 sps:$4 sm:$0xff]  }
  0x14   :  { %244 = vmatpush1.bf16.msra.mxu0 %v546_v1  ;;  %v552_v5 = vld [vmem:[#allocation2 + $0x20] ss:$8 sps:$4 sm:$0xff]   ;;  %v553_v6 = vld [vmem:[#allocation2 + $0x34] ss:$8 sps:$4 sm:$0xff]   ;;  %v555_v7 = vld [vmem:[#allocation2 + $0x30] ss:$8 sps:$4 sm:$0xff]  }
  0x15   :  { %245 = vmatprep.subr.bf16.mxu0 %v547_v2  ;;  %v556_v8 = vld [vmem:[#allocation2 + $0x44] ss:$8 sps:$4 sm:$0xff]   ;;  %v558_v9 = vld [vmem:[#allocation2 + $0x40] ss:$8 sps:$4 sm:$0xff]   ;;  %v559_v10 = vld [vmem:[#allocation2 + $0x54] ss:$8 sps:$4 sm:$0xff]  }
  0x16   :  { %v561_v11 = vld [vmem:[#allocation2 + $0x50] ss:$8 sps:$4 sm:$0xff]   ;;  %v562_v12 = vld [vmem:[#allocation2 + $0x64] ss:$8 sps:$4 sm:$0xff]   ;;  %v564_v13 = vld [vmem:[#allocation2 + $0x60] ss:$8 sps:$4 sm:$0xff]  }
  0x17   :  { %v36_v14 = vld [vmem:[%s740_s0 + $0x8] sm:$0xff]  ;;  %v565_v15 = vld [vmem:[#allocation2 + $0x74] ss:$8 sps:$4 sm:$0xff]   ;;  %v592_v17 = vld [vmem:[%s743_s3 + $0x40] sm:$0xff]   ;;  %v74_v53 = vshrl.u32 %v73_v52, 7  ;;  %vm463_vm0 = vcmask 15360  }
  0x18   :  { %246 = vmatpush1.bf16.msra.mxu0 %v549_v3  ;;  %v38_v16 = vpack.c.bf16 %v36_v14, %v36_v14  ;;  %v593_v18 = vld [vmem:[%s743_s3] sm:$0xff]   ;;  %v594_v19 = vld [vmem:[%s743_s3 + $0x48] sm:$0xff]   ;;  %v567_v20 = vld [vmem:[#allocation2 + $0x70] ss:$8 sps:$4 sm:$0xff]   ;;  %519 = vmatprep.subr.bf16.mxu1 %v592_v17 }
  0x19   :  { %247 = vmatprep.subr.bf16.mxu0 %v550_v4  ;;  %520 = vmatpush3.bf16.msra.mxu1 %v593_v18  ;;  %v595_v21 = vld [vmem:[%s743_s3 + $0x8] sm:$0xff]   ;;  %v596_v22 = vld [vmem:[%s743_s3 + $0x50] sm:$0xff]   ;;  %v598_v26 = vld [vmem:[%s743_s3 + $0x58] sm:$0xff]   ;;  %v75_v54 = vsub.s32 0, %v74_v53  ;;  %v79_v56 = vsub.s32 1, %v74_v53 }
  0x1a   :  { %275 = vmatprep.mubr.bf16.mxu0 %v38_v16  ;;  %521 = vmatprep.subr.bf16.mxu1 %v594_v19  ;;  %v568_v23 = vld [vmem:[#allocation2 + $0x84] ss:$8 sps:$4 sm:$0xff]   ;;  %v570_v24 = vld [vmem:[#allocation2 + $0x80] ss:$8 sps:$4 sm:$0xff]   ;;  %v597_v25 = vld [vmem:[%s743_s3 + $0x10] sm:$0xff]  }
  0x1b   :  { %v571_v27 = vld [vmem:[#allocation2 + $0x94] ss:$8 sps:$4 sm:$0xff]   ;;  %v573_v28 = vld [vmem:[#allocation2 + $0x90] ss:$8 sps:$4 sm:$0xff]   ;;  %v574_v30 = vld [vmem:[#allocation2 + $0xa4] ss:$8 sps:$4 sm:$0xff]  }
  0x1c   :  { %248 = vmatpush1.bf16.msra.mxu0 %v552_v5  ;;  %v599_v29 = vld [vmem:[%s743_s3 + $0x18] sm:$0xff]   ;;  %v600_v31 = vld [vmem:[%s743_s3 + $0x60] sm:$0xff]   ;;  %v602_v34 = vld [vmem:[%s743_s3 + $0x68] sm:$0xff]  }
  0x1d   :  { %249 = vmatprep.subr.bf16.mxu0 %v553_v6  ;;  %522 = vmatpush3.bf16.msra.mxu1 %v595_v21  ;;  %v601_v32 = vld [vmem:[%s743_s3 + $0x20] sm:$0xff]   ;;  %v577_v35 = vld [vmem:[#allocation2 + $0xb4] ss:$8 sps:$4 sm:$0xff]   ;;  %v603_v36 = vld [vmem:[%s743_s3 + $0x28] sm:$0xff]  }
  0x1e   :  { %523 = vmatprep.subr.bf16.mxu1 %v596_v22  ;;  %v576_v33 = vld [vmem:[#allocation2 + $0xa0] ss:$8 sps:$4 sm:$0xff]   ;;  %v579_v37 = vld [vmem:[#allocation2 + $0xb0] ss:$8 sps:$4 sm:$0xff]   ;;  %v580_v38 = vld [vmem:[#allocation2 + $0xc4] ss:$8 sps:$4 sm:$0xff]  }
  0x1f   :  { %v582_v39 = vld [vmem:[#allocation2 + $0xc0] ss:$8 sps:$4 sm:$0xff]   ;;  %v583_v40 = vld [vmem:[#allocation2 + $0xd4] ss:$8 sps:$4 sm:$0xff]   ;;  %v585_v41 = vld [vmem:[#allocation2 + $0xd0] ss:$8 sps:$4 sm:$0xff]  }
  0x20   :  { %250 = vmatpush1.bf16.msra.mxu0 %v555_v7  ;;  %v586_v42 = vld [vmem:[#allocation2 + $0xe4] ss:$8 sps:$4 sm:$0xff]   ;;  %v588_v43 = vld [vmem:[#allocation2 + $0xe0] ss:$8 sps:$4 sm:$0xff]   ;;  %v589_v44 = vld [vmem:[#allocation2 + $0xf4] ss:$8 sps:$4 sm:$0xff]  }
  0x21   :  { %251 = vmatprep.subr.bf16.mxu0 %v556_v8  ;;  %524 = vmatpush3.bf16.msra.mxu1 %v597_v25  ;;  %v591_v45 = vld [vmem:[#allocation2 + $0xf0] ss:$8 sps:$4 sm:$0xff]   ;;  %v35_v46 = vld [vmem:[%s740_s0] sm:$0xff] }
  0x22   :  { %525 = vmatprep.subr.bf16.mxu1 %v598_v26  ;;  %v37_v47 = vpack.c.bf16 %v35_v46, %v35_v46  ;;  %v604_v48 = vld [vmem:[%s743_s3 + $0x70] sm:$0xff]   ;;  %v606_v50 = vld [vmem:[%s743_s3 + $0x78] sm:$0xff]   ;;  %v71_v55 = vld [vmem:[%s742_s2] sm:$0x3] }
  0x23   :  { %v605_v49 = vld [vmem:[%s743_s3 + $0x30] sm:$0xff]   ;;  %v607_v51 = vld [vmem:[%s743_s3 + $0x38] sm:$0xff]   ;;  %v76_v57 = vrot.slane %v71_v55, %v75_v54  ;;  %v80_v58 = vrot.slane %v71_v55, %v79_v56  ;;  %v502_v6 = vld [vmem:[%s744_s4] ss:$0 sm:$0xff] }
  0x24   :  { %252 = vmatpush1.bf16.msra.mxu0 %v558_v9 }
  0x25   :  { %253 = vmatprep.subr.bf16.mxu0 %v559_v10  ;;  %526 = vmatpush3.bf16.msra.mxu1 %v599_v29 }
  0x26   :  { %527 = vmatprep.subr.bf16.mxu1 %v600_v31 }
  0x28   :  { %254 = vmatpush1.bf16.msra.mxu0 %v561_v11 }
  0x29   :  { %255 = vmatprep.subr.bf16.mxu0 %v562_v12  ;;  %528 = vmatpush3.bf16.msra.mxu1 %v601_v32 }
  0x2a   :  { %529 = vmatprep.subr.bf16.mxu1 %v602_v34 }
  0x2c   :  { %256 = vmatpush1.bf16.msra.mxu0 %v564_v13 }
  0x2d   :  { %257 = vmatprep.subr.bf16.mxu0 %v565_v15  ;;  %530 = vmatpush3.bf16.msra.mxu1 %v603_v36 }
  0x2e   :  { %531 = vmatprep.subr.bf16.mxu1 %v604_v48 }
  0x30   :  { %258 = vmatpush1.bf16.msra.mxu0 %v567_v20 }
  0x31   :  { %259 = vmatprep.subr.bf16.mxu0 %v568_v23  ;;  %532 = vmatpush3.bf16.msra.mxu1 %v605_v49 }
  0x32   :  { %533 = vmatprep.subr.bf16.mxu1 %v606_v50 }
  0x34   :  { %260 = vmatpush1.bf16.msra.mxu0 %v570_v24 }
  0x35   :  { %261 = vmatprep.subr.bf16.mxu0 %v571_v27  ;;  %534 = vmatpush3.bf16.msra.mxu1 %v607_v51 }
  0x38   :  { %262 = vmatpush1.bf16.msra.mxu0 %v573_v28 }
  0x39   :  { %263 = vmatprep.subr.bf16.mxu0 %v574_v30 }
  0x3c   :  { %264 = vmatpush1.bf16.msra.mxu0 %v576_v33 }
  0x3d   :  { %265 = vmatprep.subr.bf16.mxu0 %v577_v35 }
  0x40   :  { %266 = vmatpush1.bf16.msra.mxu0 %v579_v37 }
  0x41   :  { %267 = vmatprep.subr.bf16.mxu0 %v580_v38 }
  0x44   :  { %268 = vmatpush1.bf16.msra.mxu0 %v582_v39 }
  0x45   :  { %269 = vmatprep.subr.bf16.mxu0 %v583_v40 }
  0x48   :  { %270 = vmatpush1.bf16.msra.mxu0 %v585_v41 }
  0x49   :  { %271 = vmatprep.subr.bf16.mxu0 %v586_v42 }
  0x4c   :  { %272 = vmatpush1.bf16.msra.mxu0 %v588_v43 }
  0x4d   :  { %273 = vmatprep.subr.bf16.mxu0 %v589_v44 }
  0x50   :  { %274 = vmatpush1.bf16.msra.mxu0 %v591_v45 }
  0x53   :  { %276 = vmatmul.mubr.bf16.vlgmr.msra.gmra.mrb[0].mxu0 %v37_v47 }
 0x126   :  { %v277_v59 = vpop.f32.mrb[0].mxu0 }
 0x127   :  { %v278_v60 = vadd.f32 %v277_v59, %v76_v57  ;;  %v279_v61 = vpop.f32.mrb[1].mxu0 }
 0x128   :  { %v280_v62 = vadd.f32 %v279_v61, %v80_v58  ;;  %v281_v63 = vpop.f32.mrb[2].mxu0 }
 0x129   :  { %v284_v0 = vmax.f32 %v278_v60, 0.0  ;;  %v282_v1 = vpop.f32.mrb[3].mxu0 }
 0x12a   :  { %v285_v2 = vmax.f32 %v280_v62, 0.0 }
 0x12b   :  { %v286_v4 = vpack.c.bf16 %v284_v0, %v284_v0 }
 0x12c   :  { %v287_v3 = vpack.c.bf16 %v285_v2, %v285_v2 }
 0x12e   :  { %455 = vmatprep.mubr.bf16.mxu1 %v287_v3 }
 0x12f   :  { %456 = vmatmul.mubr.bf16.vlgmr.msra.gmra.mrb[0].mxu1 %v286_v4 }
 0x202   :  { %v535_v5 = vpop.f32.mrb[0].mxu1 }
 0x203   :  { %v536_v7 = vpop.f32.mrb[1].mxu1 }
 0x204   :  { %v537_v8 = vadd.f32 %v536_v7, %v535_v5  ;;  %v538_v9 = vpop.f32.mrb[2].mxu1 }
 0x205   :  { %v539_v10 = vpop.f32.mrb[3].mxu1 }
 0x206   :  { %v458_v11 = vadd.f32 %v537_v8, %v502_v6 }
 0x208   :  { %464 = vst.msk [vmem:[%s745_s5] sm:$0xff] %vm463_vm0, %v458_v11 }
 0x209   :  { %469 = vsyncpa [#allocation3], 1 }

</bundles_post_ra>
